<compile_context>
chip_gen: v6e
topology: v6e:2x2x1
jax: 0.10.0
libtpu: 0.0.40
codegen_flags: <defaults>
</compile_context>

<pallas_src>
import functools

import jax
import jax.numpy as jnp
from jax.experimental import pallas as pl
from jax.experimental.pallas import tpu as pltpu

_BN_EPS = 1e-5


def _round_up(x, m):
    return ((x + m - 1) // m) * m


def _pad_2d(a, rows, cols):
    return jnp.pad(a, ((0, rows - a.shape[0]), (0, cols - a.shape[1])))


# ---------------------------------------------------------------------------
# Fused Pallas kernel: entire MLP forward for one batch tile.
# ---------------------------------------------------------------------------
def _fused_mlp_kernel(*refs, meta, pre_bn, pre_mask, pre_activation,
                      n_real, matmul_dtype, needs_row_mask):
    """refs = (x, w_1..w_L, vecs, out).

    `meta` is a static per-layer layout; each entry has
      w     : operand index of the padded (matmul_dtype) weight
      b     : row index into `vecs` of the bias (non-BN layers) or None
      gamma / beta : row indices of the BN affine (BN layers) or None
      bn, relu     : bools
      mask  : re-zero padded batch rows after this layer (only needed when a
              LATER layer computes BN statistics).
    """
    out_ref = refs[-1]
    vecs_ref = refs[-2]

    h = refs[0][...].astype(jnp.float32)          # (tm, D0_pad)
    n_rows = h.shape[0]
    inv_n = jnp.float32(1.0 / n_real)

    row_mask = None
    if needs_row_mask:
        rows = jax.lax.broadcasted_iota(jnp.int32, (n_rows, 1), 0)
        row_mask = (rows < n_real).astype(jnp.float32)

    def vec(row, width):                          # (1, width) f32 view
        return vecs_ref[row:row + 1, :width]

    def batch_norm(y, gamma, beta):
        # Training-mode batch statistics over the REAL batch rows.  Padded
        # rows are kept exactly zero upstream, so one-pass sums / n_real are
        # exact.  Fused affine: y*scale + shift (halves the VPU epilogue).
        # TODO(synk): eval-mode (running_mean / running_var) BN not modeled.
        s = jnp.sum(y, axis=0, keepdims=True)
        ss = jnp.sum(y * y, axis=0, keepdims=True)
        mean = s * inv_n
        var = jnp.maximum(ss * inv_n - mean * mean, 0.0)   # cancellation clamp
        scale = gamma * jax.lax.rsqrt(var + _BN_EPS)
        shift = beta - mean * scale
        return y * scale + shift

    def matmul(a, w):
        if a.dtype != matmul_dtype:
            a = a.astype(matmul_dtype)            # weights already pre-cast
        return jnp.dot(a, w, preferred_element_type=jnp.float32)

    if pre_bn is not None:
        g_row, b_row = pre_bn
        d0 = h.shape[1]
        h = batch_norm(h, vec(g_row, d0), vec(b_row, d0))
        if pre_mask and row_mask is not None:
            h = h * row_mask
    if pre_activation:
        h = jnp.maximum(h, 0.0)

    for lm in meta:
        w = refs[lm["w"]][...]
        p_out = w.shape[1]
        y = matmul(h, w)
        if lm["bn"]:
            # Linear bias omitted: it is cancelled exactly by the BN mean
            # subtraction (beta provides the learned shift).
            y = batch_norm(y, vec(lm["gamma"], p_out), vec(lm["beta"], p_out))
        else:
            y = y + vec(lm["b"], p_out)
        if lm["relu"]:
            y = jnp.maximum(y, 0.0)
        if lm["mask"] and row_mask is not None:
            # Keep padded rows exactly zero so the NEXT layer's BN statistics
            # stay correct.  (No mask after the last BN layer: the final
            # Linear has no BN and output padding is stripped by the wrapper.)
            y = y * row_mask
        h = y

    out_ref[...] = h.astype(out_ref.dtype)


# ---------------------------------------------------------------------------
# MLP module (parameters + fused Pallas forward)
# ---------------------------------------------------------------------------
class MLPPallas:
    def __init__(self, num_layers, layer_dim, key,
                 pre_batchnorm=False, pre_activation=False, batch_norm=True,
                 matmul_dtype=jnp.float32):
        assert num_layers > 0
        self.num_layers = num_layers
        self.layer_dim = list(layer_dim)
        self.pre_batchnorm = pre_batchnorm
        self.pre_activation = pre_activation
        self.batch_norm = batch_norm
        self.matmul_dtype = matmul_dtype
        self.dim_in = layer_dim[0]
        self.dim_out = layer_dim[-1]
        # Lane-dense padded feature widths (multiples of 128).
        self.pdims = [_round_up(d, 128) for d in self.layer_dim]
        d_maxp = max(self.pdims)

        self.params = {}   # un-padded f32 -- used by the pure-JAX reference
        self.weights = []  # padded, pre-cast to matmul_dtype -- kernel operands
        vec_rows = []      # stacked (1, d_maxp) f32 rows (gamma / beta / bias)

        def add_vec(v):
            vec_rows.append(_pad_2d(v, 1, d_maxp))
            return len(vec_rows) - 1

        self.pre_bn_rows = None
        if pre_batchnorm:
            g = jnp.ones((1, layer_dim[0]), jnp.float32)
            b = jnp.zeros((1, layer_dim[0]), jnp.float32)
            self.params["pre_bn_gamma"] = g
            self.params["pre_bn_beta"] = b
            self.pre_bn_rows = (add_vec(g), add_vec(b))

        # nn.Linear default init: U(-1/sqrt(fan_in), 1/sqrt(fan_in)).
        self.layer_meta = []
        for i in range(1, num_layers + 1):
            d_in, d_out = layer_dim[i - 1], layer_dim[i]
            p_in, p_out = self.pdims[i - 1], self.pdims[i]
            key, kw, kb = jax.random.split(key, 3)
            bound = 1.0 / (float(d_in) ** 0.5)
            # Stored already transposed: (d_in, d_out).
            w = jax.random.uniform(kw, (d_in, d_out), jnp.float32, -bound, bound)
            b = jax.random.uniform(kb, (1, d_out), jnp.float32, -bound, bound)
            self.params[f"w{i}"] = w
            self.params[f"b{i}"] = b
            # Pad + pre-cast ONCE (halves DMA/VMEM bytes when bf16).
            self.weights.append(_pad_2d(w, p_in, p_out).astype(matmul_dtype))

            lm = {"bn": (i < num_layers) and batch_norm,
                  "relu": i < num_layers,
                  "b": None, "gamma": None, "beta": None,
                  "w": i}   # operand order: [x, w_1..w_L, vecs]
            if lm["bn"]:
                g = jnp.ones((1, d_out), jnp.float32)
                bt = jnp.zeros((1, d_out), jnp.float32)
                self.params[f"bn_gamma{i}"] = g
                self.params[f"bn_beta{i}"] = bt
                lm["gamma"] = add_vec(g)
                lm["beta"] = add_vec(bt)
            else:
                lm["b"] = add_vec(b)
            self.layer_meta.append(lm)

        # Mask padded rows only when a LATER layer computes BN statistics.
        for j, lm in enumerate(self.layer_meta):
            lm["mask"] = any(m["bn"] for m in self.layer_meta[j + 1:])
        self.pre_mask = any(m["bn"] for m in self.layer_meta)

        # All per-layer (1, D) vectors stacked into one operand.
        self.vecs = jnp.concatenate(vec_rows, axis=0)   # (n_vec, d_maxp) f32

    def __call__(self, x, m_tile=256):
        n = x.shape[0]
        align = 16 if self.matmul_dtype == jnp.bfloat16 else 8
        d0, d0p = self.dim_in, self.pdims[0]
        p_last = self.pdims[-1]

        any_bn = self.pre_batchnorm or any(m["bn"] for m in self.layer_meta)
        if any_bn:
            # Exact full-batch BN statistics need the whole batch in one tile.
            # TODO(synk): add a two-pass (stats pass + normalize pass)
            # cross-tile BN scheme so the M grid can also shard across v7x's
            # two TensorCores when BatchNorm is present.
            tm = _round_up(max(n, align), align)
        else:
            # No cross-batch coupling: shard the batch across M-tiles
            # ("parallel" => megacore sharding); weights stay resident.
            tm = min(_round_up(m_tile, align), _round_up(max(n, align), align))
        n_pad = _round_up(max(n, align), tm)
        num_tiles = n_pad // tm

        # Zero-pad input to (N_pad, D0_pad): padded rows/cols must be zero.
        xp = jnp.zeros((n_pad, d0p), jnp.float32).at[:n, :d0].set(
            x.astype(jnp.float32))

        operands = [xp] + list(self.weights) + [self.vecs]

        needs_row_mask = (n_pad != n) and (
            self.pre_mask or any(m["mask"] for m in self.layer_meta))

        kernel = functools.partial(
            _fused_mlp_kernel,
            meta=tuple(dict(m) for m in self.layer_meta),
            pre_bn=self.pre_bn_rows,
            pre_mask=self.pre_mask,
            pre_activation=self.pre_activation,
            n_real=n,
            matmul_dtype=self.matmul_dtype,
            needs_row_mask=needs_row_mask,
        )

        # Weights / vecs: same block index every step => resident in VMEM.
        in_specs = [pl.BlockSpec((tm, d0p), lambda i: (i, 0))]
        in_specs += [pl.BlockSpec(w.shape, lambda i: (0, 0))
                     for w in self.weights]
        in_specs += [pl.BlockSpec(self.vecs.shape, lambda i: (0, 0))]
        out_specs = pl.BlockSpec((tm, p_last), lambda i: (i, 0))
        out_shape = jax.ShapeDtypeStruct((n_pad, p_last), jnp.float32)

        # VMEM budget: resident weights + stacked vectors (double-buffer
        # headroom) + streamed x/out tiles + live activations, capped
        # per-generation via the hardware query.
        weight_bytes = sum(int(w.size) * w.dtype.itemsize for w in self.weights)
        vec_bytes = int(self.vecs.size) * 4
        tile_bytes = tm * (d0p + p_last) * 4
        act_bytes = 2 * tm * max(self.pdims) * 4
        needed = (2 * (weight_bytes + vec_bytes) + 2 * tile_bytes
                  + act_bytes + (4 << 20))
        try:
            cap = int(pltpu.get_tpu_info().vmem_capacity_bytes)
        except Exception:
            cap = 64 << 20
        vmem_limit = int(min(max(needed, 32 << 20), int(0.9 * cap)))
        # TODO(synk): if per-layer weights ever exceed this budget, stream each
        # weight along K with pltpu.emit_pipeline instead of keeping them all
        # resident.

        out = pl.pallas_call(
            kernel,
            out_shape=out_shape,
            grid=(num_tiles,),
            in_specs=in_specs,
            out_specs=out_specs,
            compiler_params=pltpu.CompilerParams(
                dimension_semantics=("parallel",),
                vmem_limit_bytes=vmem_limit),
        )(*operands)

        # Strip padding.
        return out[:n, :self.dim_out]


# ---------------------------------------------------------------------------
# Pure-JAX reference (same math, un-padded, f32) for sanity checks
# ---------------------------------------------------------------------------
def _reference_forward(mlp: MLPPallas, x):
    h = x.astype(jnp.float32)

    def mm(a, w):
        return jnp.dot(a, w, precision=jax.lax.Precision.HIGHEST)

    def bn(h, gamma, beta):
        mean = jnp.mean(h, axis=0, keepdims=True)
        var = jnp.mean((h - mean) ** 2, axis=0, keepdims=True)
        return gamma * (h - mean) / jnp.sqrt(var + _BN_EPS) + beta

    if mlp.pre_batchnorm:
        h = bn(h, mlp.params["pre_bn_gamma"], mlp.params["pre_bn_beta"])
    if mlp.pre_activation:
        h = jnp.maximum(h, 0.0)
    for i in range(1, mlp.num_layers + 1):
        h = mm(h, mlp.params[f"w{i}"]) + mlp.params[f"b{i}"]
        if i < mlp.num_layers:
            if mlp.batch_norm:
                h = bn(h, mlp.params[f"bn_gamma{i}"], mlp.params[f"bn_beta{i}"])
            h = jnp.maximum(h, 0.0)
    return h


if __name__ == "__main__":
    key = jax.random.PRNGKey(0)
    key, k_param, k_x = jax.random.split(key, 3)

    num_layers = 3
    layer_dim = [32, 64, 48, 16]
    batch = 8

    x = jax.random.normal(k_x, (batch, layer_dim[0]), jnp.float32)

    # 1) Default: Linear -> BN -> ReLU stack, f32 matmul.
    mlp = MLPPallas(num_layers, layer_dim, k_param, batch_norm=True)
    out = mlp(x)
    jax.block_until_ready(out)
    ref = _reference_forward(mlp, x)
    assert out.shape == (batch, layer_dim[-1])
    assert jnp.allclose(out, ref, atol=5e-3, rtol=5e-3), "f32 mismatch"

    # 2) Ragged batch (6 -> padded to 8): row-mask / real-N BN statistics.
    x6 = jax.random.normal(jax.random.PRNGKey(1), (6, layer_dim[0]), jnp.float32)
    out6 = mlp(x6)
    jax.block_until_ready(out6)
    assert jnp.allclose(out6, _reference_forward(mlp, x6),
                        atol=5e-3, rtol=5e-3), "ragged-batch mismatch"

    # 3) pre_batchnorm + pre_activation branches.
    mlp_pre = MLPPallas(num_layers, layer_dim, k_param,
                        pre_batchnorm=True, pre_activation=True, batch_norm=True)
    out_pre = mlp_pre(x)
    jax.block_until_ready(out_pre)
    assert jnp.allclose(out_pre, _reference_forward(mlp_pre, x),
                        atol=5e-3, rtol=5e-3), "pre-BN mismatch"

    # 4) batch_norm=False: exercises the multi-tile "parallel" batch grid
    #    (weights resident, x/out streamed per 16-row M-tile, 3 tiles).
    mlp_nobn = MLPPallas(num_layers, layer_dim, k_param, batch_norm=False)
    x40 = jax.random.normal(jax.random.PRNGKey(2), (40, layer_dim[0]),
                            jnp.float32)
    out_nobn = mlp_nobn(x40, m_tile=16)
    jax.block_until_ready(out_nobn)
    assert out_nobn.shape == (40, layer_dim[-1])
    assert jnp.allclose(out_nobn, _reference_forward(mlp_nobn, x40),
                        atol=5e-3, rtol=5e-3), "no-BN grid mismatch"

    # 5) bf16 matmul: weights pre-cast once at construction, f32 accumulation
    #    + f32 BN/ReLU epilogue, batch padded to a multiple of 16.
    mlp_bf16 = MLPPallas(num_layers, layer_dim, k_param, batch_norm=True,
                         matmul_dtype=jnp.bfloat16)
    out_bf = mlp_bf16(x)
    jax.block_until_ready(out_bf)
    assert jnp.allclose(out_bf, _reference_forward(mlp, x),
                        atol=1e-1, rtol=1e-1), "bf16 mismatch"

    print("KERNEL_OK")
</pallas_src>

<mosaic_0001>
module attributes {stable_mosaic.version = 11 : i64} {
  func.func @_fused_mlp_kernel(%arg0: i32, %arg1: memref<8x128xf32, #tpu.memory_space<vmem>>, %arg2: memref<128x128xf32, #tpu.memory_space<vmem>>, %arg3: memref<128x128xf32, #tpu.memory_space<vmem>>, %arg4: memref<128x128xf32, #tpu.memory_space<vmem>>, %arg5: memref<5x128xf32, #tpu.memory_space<vmem>>, %arg6: memref<8x128xf32, #tpu.memory_space<vmem>>) attributes {dimension_semantics = [#tpu.dimension_semantics<parallel>], iteration_bounds = array<i64: 1>, scalar_prefetch = 0 : i64, scratch_operands = 0 : i64, tpu.core_type = #tpu.core_type<tc>, window_params = [{transform_indices = @transform_0, window_bounds = array<i64: 8, 128>}, {pipeline_mode = #tpu.pipeline_mode<synchronous>, transform_indices = @transform_1, window_bounds = array<i64: 128, 128>}, {pipeline_mode = #tpu.pipeline_mode<synchronous>, transform_indices = @transform_2, window_bounds = array<i64: 128, 128>}, {pipeline_mode = #tpu.pipeline_mode<synchronous>, transform_indices = @transform_3, window_bounds = array<i64: 128, 128>}, {pipeline_mode = #tpu.pipeline_mode<synchronous>, transform_indices = @transform_4, window_bounds = array<i64: 5, 128>}, {transform_indices = @transform_5, window_bounds = array<i64: 8, 128>}]} {
    %c0 = arith.constant 0 : index
    %c0_0 = arith.constant 0 : index
    %0 = vector.load %arg1[%c0, %c0_0] : memref<8x128xf32, #tpu.memory_space<vmem>>, vector<8x128xf32>
    %c0_1 = arith.constant 0 : index
    %c0_2 = arith.constant 0 : index
    %1 = vector.load %arg2[%c0_1, %c0_2] : memref<128x128xf32, #tpu.memory_space<vmem>>, vector<128x128xf32>
    %cst = arith.constant dense<0.000000e+00> : vector<8x128xf32>
    %2 = tpu.matmul %0, %1, %cst {dimension_numbers = #tpu.dot_dimension_numbers<[1], [0], [0], [1], [0, 0, 1, 1], [], []>} : vector<8x128xf32>, vector<128x128xf32>, vector<8x128xf32> -> vector<8x128xf32>
    %c0_3 = arith.constant 0 : index
    %c0_4 = arith.constant 0 : index
    %3 = vector.load %arg5[%c0_3, %c0_4] : memref<5x128xf32, #tpu.memory_space<vmem>>, vector<1x128xf32>
    %c1 = arith.constant 1 : index
    %c0_5 = arith.constant 0 : index
    %4 = vector.load %arg5[%c1, %c0_5] : memref<5x128xf32, #tpu.memory_space<vmem>>, vector<1x128xf32>
    %cst_6 = arith.constant dense<0.000000e+00> : vector<128xf32>
    %5 = vector.multi_reduction <add>, %2, %cst_6 [0] : vector<8x128xf32> to vector<128xf32>
    %6 = vector.shape_cast %5 : vector<128xf32> to vector<1x128xf32>
    %7 = arith.mulf %2, %2 : vector<8x128xf32>
    %cst_7 = arith.constant dense<0.000000e+00> : vector<128xf32>
    %8 = vector.multi_reduction <add>, %7, %cst_7 [0] : vector<8x128xf32> to vector<128xf32>
    %9 = vector.shape_cast %8 : vector<128xf32> to vector<1x128xf32>
    %cst_8 = arith.constant 1.250000e-01 : f32
    %10 = vector.broadcast %cst_8 : f32 to vector<1x128xf32>
    %11 = arith.mulf %6, %10 : vector<1x128xf32>
    %cst_9 = arith.constant 1.250000e-01 : f32
    %12 = vector.broadcast %cst_9 : f32 to vector<1x128xf32>
    %13 = arith.mulf %9, %12 : vector<1x128xf32>
    %14 = arith.mulf %11, %11 : vector<1x128xf32>
    %15 = arith.subf %13, %14 : vector<1x128xf32>
    %cst_10 = arith.constant 0.000000e+00 : f32
    %16 = vector.broadcast %cst_10 : f32 to vector<1x128xf32>
    %17 = arith.maximumf %15, %16 : vector<1x128xf32>
    %cst_11 = arith.constant 9.99999974E-6 : f32
    %18 = vector.broadcast %cst_11 : f32 to vector<1x128xf32>
    %19 = arith.addf %17, %18 : vector<1x128xf32>
    %20 = math.rsqrt %19 : vector<1x128xf32>
    %21 = arith.mulf %3, %20 : vector<1x128xf32>
    %22 = arith.mulf %11, %21 : vector<1x128xf32>
    %23 = arith.subf %4, %22 : vector<1x128xf32>
    %24 = vector.broadcast %21 : vector<1x128xf32> to vector<8x128xf32>
    %25 = arith.mulf %2, %24 : vector<8x128xf32>
    %26 = vector.broadcast %23 : vector<1x128xf32> to vector<8x128xf32>
    %27 = arith.addf %25, %26 : vector<8x128xf32>
    %cst_12 = arith.constant 0.000000e+00 : f32
    %28 = vector.broadcast %cst_12 : f32 to vector<8x128xf32>
    %29 = arith.maximumf %27, %28 : vector<8x128xf32>
    %c0_13 = arith.constant 0 : index
    %c0_14 = arith.constant 0 : index
    %30 = vector.load %arg3[%c0_13, %c0_14] : memref<128x128xf32, #tpu.memory_space<vmem>>, vector<128x128xf32>
    %cst_15 = arith.constant dense<0.000000e+00> : vector<8x128xf32>
    %31 = tpu.matmul %29, %30, %cst_15 {dimension_numbers = #tpu.dot_dimension_numbers<[1], [0], [0], [1], [0, 0, 1, 1], [], []>} : vector<8x128xf32>, vector<128x128xf32>, vector<8x128xf32> -> vector<8x128xf32>
    %c2 = arith.constant 2 : index
    %c0_16 = arith.constant 0 : index
    %32 = vector.load %arg5[%c2, %c0_16] : memref<5x128xf32, #tpu.memory_space<vmem>>, vector<1x128xf32>
    %c3 = arith.constant 3 : index
    %c0_17 = arith.constant 0 : index
    %33 = vector.load %arg5[%c3, %c0_17] : memref<5x128xf32, #tpu.memory_space<vmem>>, vector<1x128xf32>
    %cst_18 = arith.constant dense<0.000000e+00> : vector<128xf32>
    %34 = vector.multi_reduction <add>, %31, %cst_18 [0] : vector<8x128xf32> to vector<128xf32>
    %35 = vector.shape_cast %34 : vector<128xf32> to vector<1x128xf32>
    %36 = arith.mulf %31, %31 : vector<8x128xf32>
    %cst_19 = arith.constant dense<0.000000e+00> : vector<128xf32>
    %37 = vector.multi_reduction <add>, %36, %cst_19 [0] : vector<8x128xf32> to vector<128xf32>
    %38 = vector.shape_cast %37 : vector<128xf32> to vector<1x128xf32>
    %cst_20 = arith.constant 1.250000e-01 : f32
    %39 = vector.broadcast %cst_20 : f32 to vector<1x128xf32>
    %40 = arith.mulf %35, %39 : vector<1x128xf32>
    %cst_21 = arith.constant 1.250000e-01 : f32
    %41 = vector.broadcast %cst_21 : f32 to vector<1x128xf32>
    %42 = arith.mulf %38, %41 : vector<1x128xf32>
    %43 = arith.mulf %40, %40 : vector<1x128xf32>
    %44 = arith.subf %42, %43 : vector<1x128xf32>
    %cst_22 = arith.constant 0.000000e+00 : f32
    %45 = vector.broadcast %cst_22 : f32 to vector<1x128xf32>
    %46 = arith.maximumf %44, %45 : vector<1x128xf32>
    %cst_23 = arith.constant 9.99999974E-6 : f32
    %47 = vector.broadcast %cst_23 : f32 to vector<1x128xf32>
    %48 = arith.addf %46, %47 : vector<1x128xf32>
    %49 = math.rsqrt %48 : vector<1x128xf32>
    %50 = arith.mulf %32, %49 : vector<1x128xf32>
    %51 = arith.mulf %40, %50 : vector<1x128xf32>
    %52 = arith.subf %33, %51 : vector<1x128xf32>
    %53 = vector.broadcast %50 : vector<1x128xf32> to vector<8x128xf32>
    %54 = arith.mulf %31, %53 : vector<8x128xf32>
    %55 = vector.broadcast %52 : vector<1x128xf32> to vector<8x128xf32>
    %56 = arith.addf %54, %55 : vector<8x128xf32>
    %cst_24 = arith.constant 0.000000e+00 : f32
    %57 = vector.broadcast %cst_24 : f32 to vector<8x128xf32>
    %58 = arith.maximumf %56, %57 : vector<8x128xf32>
    %c0_25 = arith.constant 0 : index
    %c0_26 = arith.constant 0 : index
    %59 = vector.load %arg4[%c0_25, %c0_26] : memref<128x128xf32, #tpu.memory_space<vmem>>, vector<128x128xf32>
    %cst_27 = arith.constant dense<0.000000e+00> : vector<8x128xf32>
    %60 = tpu.matmul %58, %59, %cst_27 {dimension_numbers = #tpu.dot_dimension_numbers<[1], [0], [0], [1], [0, 0, 1, 1], [], []>} : vector<8x128xf32>, vector<128x128xf32>, vector<8x128xf32> -> vector<8x128xf32>
    %c4 = arith.constant 4 : index
    %c0_28 = arith.constant 0 : index
    %61 = vector.load %arg5[%c4, %c0_28] : memref<5x128xf32, #tpu.memory_space<vmem>>, vector<1x128xf32>
    %62 = vector.broadcast %61 : vector<1x128xf32> to vector<8x128xf32>
    %63 = arith.addf %60, %62 : vector<8x128xf32>
    %c0_29 = arith.constant 0 : index
    %c0_30 = arith.constant 0 : index
    %64 = vector.load %arg6[%c0_29, %c0_30] : memref<8x128xf32, #tpu.memory_space<vmem>>, vector<8x128xf32>
    tpu.vector_store %arg6[%c0_29, %c0_30], %63 {strides = array<i32>} : memref<8x128xf32, #tpu.memory_space<vmem>>, vector<8x128xf32>,
    return
  }
  func.func @transform_0(%arg0: i32) -> (i32, i32) {
    %c0_i32 = arith.constant 0 : i32
    %c0_i32_0 = arith.constant 0 : i32
    return %arg0, %c0_i32 : i32, i32
  }
  func.func @transform_1(%arg0: i32) -> (i32, i32) {
    %c0_i32 = arith.constant 0 : i32
    %c0_i32_0 = arith.constant 0 : i32
    %c0_i32_1 = arith.constant 0 : i32
    return %c0_i32, %c0_i32_0 : i32, i32
  }
  func.func @transform_2(%arg0: i32) -> (i32, i32) {
    %c0_i32 = arith.constant 0 : i32
    %c0_i32_0 = arith.constant 0 : i32
    %c0_i32_1 = arith.constant 0 : i32
    return %c0_i32, %c0_i32_0 : i32, i32
  }
  func.func @transform_3(%arg0: i32) -> (i32, i32) {
    %c0_i32 = arith.constant 0 : i32
    %c0_i32_0 = arith.constant 0 : i32
    %c0_i32_1 = arith.constant 0 : i32
    return %c0_i32, %c0_i32_0 : i32, i32
  }
  func.func @transform_4(%arg0: i32) -> (i32, i32) {
    %c0_i32 = arith.constant 0 : i32
    %c0_i32_0 = arith.constant 0 : i32
    %c0_i32_1 = arith.constant 0 : i32
    return %c0_i32, %c0_i32_0 : i32, i32
  }
  func.func @transform_5(%arg0: i32) -> (i32, i32) {
    %c0_i32 = arith.constant 0 : i32
    %c0_i32_0 = arith.constant 0 : i32
    return %arg0, %c0_i32 : i32, i32
  }
}

</mosaic_0001>

<bundles_post_ra>
// kernel: tpu_custom_call.1
= control target key start
LH: loop header
LB: loop body
LE: loop exit
PB: predicated region body
PF: predicated region fallthrough
CT: control target
= control target key end

     0   :  { %10 = vsyncpa [#allocation3], 0  ;;  %s865_s0 = inlined_call_operand.hbm [shape: f32[8,128], index: 0, kind: input, shape index: {}]   ;;  %s866_s1 = inlined_call_operand.hbm [shape: f32[128,128], index: 1, kind: input, shape index: {}]   ;;  %s867_s2 = inlined_call_operand.hbm [shape: f32[128,128], index: 2, kind: input, shape index: {}]   ;;  %s868_s3 = inlined_call_operand.hbm [shape: f32[128,128], index: 3, kind: input, shape index: {}]   ;;  %s869_s4 = inlined_call_operand.hbm [shape: f32[5,128], index: 4, kind: input, shape index: {}]   ;;  %s870_s5 = inlined_call_operand.hbm [shape: f32[8,128], index: 5, kind: output, shape index: {}]  }
   0x1   :  { %11 = vsyncpa [#allocation6], 0 }
   0x2   :  { %12 = vsyncpa [#allocation9], 0 }
   0x3   :  { %13 = vsyncpa [#allocation4], 0  ;;  %s738_s18 = smov [#allocation5]  }
   0x4   :  { %s29_s19 = sshll.u32 %s738_s18, 4  ;;  %s30_s19 = int_to_ptr.vmem [resolvable:$true] %s29_s19 }
   0x5   :  { %s618_s20 = scalar_lea.vmem %s30_s19, 2048  ;;  %p623_p1 = scmp.lt.s32.totalorder %s30_s19, %s30_s19 }
   0x6   :  { %p619_p0 = scmp.ne.s32.totalorder %s30_s19, %s618_s20  ;;  %p624_p2 = scmp.lt.s32.totalorder %s618_s20, %s618_s20 }
   0x8   :  { %p625_p3 = por %p624_p2, %p623_p1 }
   0xa   :  { %p626_p4 = pnand %p625_p3, %p619_p0 }
   0xc   :  { %629 = shalt.err (!%p626_p4)
}
   0xd   :  { %s739_s21 = smov 128   ;;  %s740_s22 = smov 8  }
   0xe   :  { %35 = dma.hbm_to_vmem [thread:$0]  %s866_s1, 2048, %s30_s19, [#allocation6], %s739_s21, %s739_s21, %s740_s22  }
   0xf   :  { %s741_s25 = smov [#allocation8]   ;;  %s742_s27 = smov [#allocation2]  }
  0x10   :  { %s53_s26 = sshll.u32 %s741_s25, 4  ;;  %s20_s28 = sshll.u32 %s742_s27, 4  ;;  %s54_s26 = int_to_ptr.vmem [resolvable:$true] %s53_s26  ;;  %s21_s28 = int_to_ptr.vmem [resolvable:$true] %s20_s28 }
  0x11   :  { %s638_s29 = scalar_lea.vmem %s54_s26, 2048  ;;  %p643_p6 = scmp.lt.s32.totalorder %s54_s26, %s54_s26 }
  0x12   :  { %p639_p5 = scmp.ne.s32.totalorder %s54_s26, %s638_s29  ;;  %p644_p7 = scmp.lt.s32.totalorder %s638_s29, %s638_s29 }
  0x14   :  { %p645_p8 = por %p644_p7, %p643_p6 }
  0x16   :  { %p646_p9 = pnand %p645_p8, %p639_p5 }
  0x18   :  { %649 = shalt.err (!%p646_p9)
}
  0x19   :  { %59 = dma.hbm_to_vmem [thread:$0]  %s868_s3, 2048, %s54_s26, [#allocation9], %s739_s21, %s739_s21, %s740_s22  }
  0x1a   :  { %s658_s1 = scalar_lea.vmem %s21_s28, 128  ;;  %p663_p11 = scmp.lt.s32.totalorder %s21_s28, %s21_s28 }
  0x1b   :  { %p659_p10 = scmp.ne.s32.totalorder %s21_s28, %s658_s1  ;;  %p664_p12 = scmp.lt.s32.totalorder %s658_s1, %s658_s1 }
  0x1d   :  { %p665_p13 = por %p664_p12, %p663_p11 }
  0x1f   :  { %p666_p0 = pnand %p665_p13, %p659_p10 }
  0x21   :  { %669 = shalt.err (!%p666_p0)
}
  0x22   :  { %23 = dma.hbm_to_vmem [thread:$0]  %s865_s0, 128, %s21_s28, [#allocation3]  }
  0x23   :  { %s743_s9 = smov [#allocation7]   ;;  %s744_s11 = smov [#allocation10]  }
  0x24   :  { %s41_s10 = sshll.u32 %s743_s9, 4  ;;  %s66_s12 = sshll.u32 %s744_s11, 4  ;;  %s42_s10 = int_to_ptr.vmem [resolvable:$true] %s41_s10  ;;  %s67_s12 = int_to_ptr.vmem [resolvable:$true] %s66_s12 }
  0x25   :  { %s678_s13 = scalar_lea.vmem %s42_s10, 2048  ;;  %p683_p2 = scmp.lt.s32.totalorder %s42_s10, %s42_s10 }
  0x26   :  { %p679_p1 = scmp.ne.s32.totalorder %s42_s10, %s678_s13  ;;  %p684_p3 = scmp.lt.s32.totalorder %s678_s13, %s678_s13 }
  0x28   :  { %p685_p4 = por %p684_p3, %p683_p2 }
  0x2a   :  { %p686_p5 = pnand %p685_p4, %p679_p1 }
  0x2c   :  { %689 = shalt.err (!%p686_p5)
}
  0x2d   :  { %47 = dma.hbm_to_vmem [thread:$0]  %s867_s2, 2048, %s42_s10, [#allocation6], %s739_s21, %s739_s21, %s740_s22  }
  0x2e   :  { %s698_s0 = scalar_lea.vmem %s67_s12, 128  ;;  %p703_p7 = scmp.lt.s32.totalorder %s67_s12, %s67_s12 }
  0x2f   :  { %p699_p6 = scmp.ne.s32.totalorder %s67_s12, %s698_s0  ;;  %p704_p8 = scmp.lt.s32.totalorder %s698_s0, %s698_s0 }
  0x31   :  { %p705_p9 = por %p704_p8, %p703_p7 }
  0x33   :  { %p706_p10 = pnand %p705_p9, %p699_p6 }
  0x35   :  { %709 = shalt.err (!%p706_p10)
}
  0x36   :  { %69 = dma.hbm_to_vmem [thread:$0]  %s869_s4, 128, %s67_s12, [#allocation9]  }
  0x37   :  { %730 = dma.done.wait [#allocation3], 128  }
  0x38   :  { %731 = vsyncadd [#allocation3], 4294967168 }
  0x39   :  { %732 = dma.done.wait [#allocation6], 4096  }
  0x3a   :  { %733 = vsyncadd [#allocation6], 4294963200 }
  0x3b   :  { %734 = dma.done.wait [#allocation9], 2176  }
  0x3c   :  { %735 = vsyncadd [#allocation9], 4294965120  ;;  %v745_v0 = vmov 0.0   ;;  %vm746_vm0 = vmmov 0   ;;  %v101_v1 = vld [vmem:[#allocation5 + $0x78] sm:$0xff]  ;;  %v100_v2 = vld [vmem:[#allocation5 + $0x70] sm:$0xff]  ;;  %v197_v55 = vlaneseq }
  0x3d   :  { %491 = vmatprep.subr.mxu0 %v745_v0  ;;  %523 = vmatprep.mubr.msk.f32.mxu0 %vm746_vm0, %v745_v0  ;;  %v99_v3 = vld [vmem:[#allocation5 + $0x68] sm:$0xff]  ;;  %v98_v4 = vld [vmem:[#allocation5 + $0x60] sm:$0xff]  ;;  %v97_v5 = vld [vmem:[#allocation5 + $0x58] sm:$0xff]  ;;  %s747_s2 = smov [#allocation11]  }
  0x3e   :  { %526 = vmatprep.subr.mxu1 %v745_v0  ;;  %558 = vmatprep.mubr.msk.f32.mxu1 %vm746_vm0, %v745_v0  ;;  %v96_v6 = vld [vmem:[#allocation5 + $0x50] sm:$0xff]  ;;  %v95_v7 = vld [vmem:[#allocation5 + $0x48] sm:$0xff]  ;;  %v94_v8 = vld [vmem:[#allocation5 + $0x40] sm:$0xff]  ;;  %v198_v56 = vshrl.u32 %v197_v55, 7  ;;  %s428_s4 = sshll.u32 %s747_s2, 4  ;;  %s429_s4 = int_to_ptr.vmem [resolvable:$true] %s428_s4 }
  0x3f   :  { %492 = vmatpush3.msra.mxu0 %v101_v1  ;;  %v93_v9 = vld [vmem:[#allocation5 + $0x38] sm:$0xff]  ;;  %v92_v10 = vld [vmem:[#allocation5 + $0x30] sm:$0xff]  ;;  %v91_v11 = vld [vmem:[#allocation5 + $0x28] sm:$0xff]  ;;  %s710_s17 = scalar_lea.vmem %s429_s4, 128  ;;  %p715_p12 = scmp.lt.s32.totalorder %s429_s4, %s429_s4 }
  0x40   :  { %493 = vmatprep.subr.mxu0 %v745_v0  ;;  %v90_v12 = vld [vmem:[#allocation5 + $0x20] sm:$0xff]  ;;  %v89_v13 = vld [vmem:[#allocation5 + $0x18] sm:$0xff]  ;;  %v88_v14 = vld [vmem:[#allocation5 + $0x10] sm:$0xff]  ;;  %v841_v58 = vsub.s32 0, %v198_v56  ;;  %p711_p11 = scmp.ne.s32.totalorder %s429_s4, %s710_s17  ;;  %p716_p13 = scmp.lt.s32.totalorder %s710_s17, %s710_s17 }
  0x41   :  { %494 = vmatpush3.msra.mxu0 %v100_v2  ;;  %v87_v15 = vld [vmem:[#allocation5 + $0x8] sm:$0xff]  ;;  %v86_v16 = vld [vmem:[#allocation5] sm:$0xff]  ;;  %v85_v17 = vld [vmem:[#allocation2] sm:$0xff] }
  0x42   :  { %495 = vmatprep.subr.mxu0 %v745_v0  ;;  %v223_v18 = vld [vmem:[#allocation7 + $0x78] sm:$0xff]  ;;  %v222_v19 = vld [vmem:[#allocation7 + $0x70] sm:$0xff]  ;;  %v221_v20 = vld [vmem:[#allocation7 + $0x68] sm:$0xff]  ;;  %p717_p0 = por %p716_p13, %p715_p12 }
  0x43   :  { %496 = vmatpush3.msra.mxu0 %v99_v3  ;;  %527 = vmatpush3.msra.mxu1 %v223_v18  ;;  %v220_v21 = vld [vmem:[#allocation7 + $0x60] sm:$0xff]  ;;  %v219_v22 = vld [vmem:[#allocation7 + $0x58] sm:$0xff]  ;;  %v218_v23 = vld [vmem:[#allocation7 + $0x50] sm:$0xff] }
  0x44   :  { %497 = vmatprep.subr.mxu0 %v745_v0  ;;  %528 = vmatprep.subr.mxu1 %v745_v0  ;;  %v217_v24 = vld [vmem:[#allocation7 + $0x48] sm:$0xff]  ;;  %v216_v25 = vld [vmem:[#allocation7 + $0x40] sm:$0xff]  ;;  %v215_v26 = vld [vmem:[#allocation7 + $0x38] sm:$0xff]  ;;  %p718_p1 = pnand %p717_p0, %p711_p11 }
  0x45   :  { %498 = vmatpush3.msra.mxu0 %v98_v4  ;;  %529 = vmatpush3.msra.mxu1 %v222_v19  ;;  %v214_v27 = vld [vmem:[#allocation7 + $0x30] sm:$0xff]  ;;  %v213_v28 = vld [vmem:[#allocation7 + $0x28] sm:$0xff]  ;;  %v212_v29 = vld [vmem:[#allocation7 + $0x20] sm:$0xff] }
  0x46   :  { %499 = vmatprep.subr.mxu0 %v745_v0  ;;  %530 = vmatprep.subr.mxu1 %v745_v0  ;;  %v211_v30 = vld [vmem:[#allocation7 + $0x18] sm:$0xff]  ;;  %v210_v31 = vld [vmem:[#allocation7 + $0x10] sm:$0xff]  ;;  %v209_v32 = vld [vmem:[#allocation7 + $0x8] sm:$0xff] }
  0x47   :  { %500 = vmatpush3.msra.mxu0 %v97_v5  ;;  %531 = vmatpush3.msra.mxu1 %v221_v20  ;;  %v208_v33 = vld [vmem:[#allocation7] sm:$0xff]  ;;  %v333_v18 = vld [vmem:[#allocation8 + $0x18] sm:$0xff]  ;;  %v332_v19 = vld [vmem:[#allocation8 + $0x10] sm:$0xff] }
  0x48   :  { %501 = vmatprep.subr.mxu0 %v745_v0  ;;  %532 = vmatprep.subr.mxu1 %v745_v0  ;;  %v172_v57 = vld [vmem:[#allocation10] sm:$0x1]  ;;  %v173_v61 = vld [vmem:[#allocation10 + $0x1] sm:$0x1]  ;;  %v331_v20 = vld [vmem:[#allocation8 + $0x8] sm:$0xff] }
  0x49   :  { %502 = vmatpush3.msra.mxu0 %v96_v6  ;;  %533 = vmatpush3.msra.mxu1 %v220_v21  ;;  %v345_v6 = vld [vmem:[#allocation8 + $0x78] sm:$0xff]  ;;  %v330_v21 = vld [vmem:[#allocation8] sm:$0xff] }
  0x4a   :  { %503 = vmatprep.subr.mxu0 %v745_v0  ;;  %534 = vmatprep.subr.mxu1 %v745_v0 }
  0x4b   :  { %504 = vmatpush3.msra.mxu0 %v95_v7  ;;  %535 = vmatpush3.msra.mxu1 %v219_v22  ;;  %v344_v7 = vld [vmem:[#allocation8 + $0x70] sm:$0xff] }
  0x4c   :  { %505 = vmatprep.subr.mxu0 %v745_v0  ;;  %536 = vmatprep.subr.mxu1 %v745_v0 }
  0x4d   :  { %506 = vmatpush3.msra.mxu0 %v94_v8  ;;  %537 = vmatpush3.msra.mxu1 %v218_v23  ;;  %v343_v8 = vld [vmem:[#allocation8 + $0x68] sm:$0xff] }
  0x4e   :  { %507 = vmatprep.subr.mxu0 %v745_v0  ;;  %538 = vmatprep.subr.mxu1 %v745_v0 }
  0x4f   :  { %508 = vmatpush3.msra.mxu0 %v93_v9  ;;  %539 = vmatpush3.msra.mxu1 %v217_v24  ;;  %v342_v9 = vld [vmem:[#allocation8 + $0x60] sm:$0xff] }
  0x50   :  { %509 = vmatprep.subr.mxu0 %v745_v0  ;;  %540 = vmatprep.subr.mxu1 %v745_v0 }
  0x51   :  { %510 = vmatpush3.msra.mxu0 %v92_v10  ;;  %541 = vmatpush3.msra.mxu1 %v216_v25  ;;  %v341_v10 = vld [vmem:[#allocation8 + $0x58] sm:$0xff] }
  0x52   :  { %511 = vmatprep.subr.mxu0 %v745_v0  ;;  %542 = vmatprep.subr.mxu1 %v745_v0 }
  0x53   :  { %512 = vmatpush3.msra.mxu0 %v91_v11  ;;  %543 = vmatpush3.msra.mxu1 %v215_v26  ;;  %v340_v11 = vld [vmem:[#allocation8 + $0x50] sm:$0xff] }
  0x54   :  { %513 = vmatprep.subr.mxu0 %v745_v0  ;;  %544 = vmatprep.subr.mxu1 %v745_v0 }
  0x55   :  { %514 = vmatpush3.msra.mxu0 %v90_v12  ;;  %545 = vmatpush3.msra.mxu1 %v214_v27  ;;  %v339_v12 = vld [vmem:[#allocation8 + $0x48] sm:$0xff] }
  0x56   :  { %515 = vmatprep.subr.mxu0 %v745_v0  ;;  %546 = vmatprep.subr.mxu1 %v745_v0 }
  0x57   :  { %516 = vmatpush3.msra.mxu0 %v89_v13  ;;  %547 = vmatpush3.msra.mxu1 %v213_v28  ;;  %v338_v13 = vld [vmem:[#allocation8 + $0x40] sm:$0xff] }
  0x58   :  { %517 = vmatprep.subr.mxu0 %v745_v0  ;;  %548 = vmatprep.subr.mxu1 %v745_v0 }
  0x59   :  { %518 = vmatpush3.msra.mxu0 %v88_v14  ;;  %549 = vmatpush3.msra.mxu1 %v212_v29  ;;  %v337_v14 = vld [vmem:[#allocation8 + $0x38] sm:$0xff] }
  0x5a   :  { %519 = vmatprep.subr.mxu0 %v745_v0  ;;  %550 = vmatprep.subr.mxu1 %v745_v0 }
  0x5b   :  { %520 = vmatpush3.msra.mxu0 %v87_v15  ;;  %551 = vmatpush3.msra.mxu1 %v211_v30  ;;  %v336_v15 = vld [vmem:[#allocation8 + $0x30] sm:$0xff] }
  0x5c   :  { %521 = vmatprep.subr.mxu0 %v745_v0  ;;  %552 = vmatprep.subr.mxu1 %v745_v0 }
  0x5d   :  { %522 = vmatpush3.msra.mxu0 %v86_v16  ;;  %553 = vmatpush3.msra.mxu1 %v210_v31  ;;  %v335_v16 = vld [vmem:[#allocation8 + $0x28] sm:$0xff] }
  0x5e   :  { %524 = vmatmul.mubr.f32.vlgmr.msra.gmra.mxu0 %v85_v17  ;;  %561 = vmatprep.subr.mxu0 %v745_v0  ;;  %v334_v17 = vld [vmem:[#allocation8 + $0x20] sm:$0xff] }
  0x5f   :  { %593 = vmatprep.mubr.msk.f32.mxu0 %vm746_vm0, %v745_v0  ;;  %554 = vmatprep.subr.mxu1 %v745_v0 }
  0x60   :  { %555 = vmatpush3.msra.mxu1 %v209_v32  ;;  %562 = vmatpush3.msra.mxu0 %v345_v6 }
  0x61   :  { %556 = vmatprep.subr.mxu1 %v745_v0  ;;  %563 = vmatprep.subr.mxu0 %v745_v0 }
  0x62   :  { %557 = vmatpush3.msra.mxu1 %v208_v33  ;;  %564 = vmatpush3.msra.mxu0 %v344_v7 }
  0x63   :  { %565 = vmatprep.subr.mxu0 %v745_v0 }
  0x64   :  { %566 = vmatpush3.msra.mxu0 %v343_v8 }
  0x65   :  { %567 = vmatprep.subr.mxu0 %v745_v0 }
  0x66   :  { %568 = vmatpush3.msra.mxu0 %v342_v9 }
  0x67   :  { %569 = vmatprep.subr.mxu0 %v745_v0 }
  0x68   :  { %570 = vmatpush3.msra.mxu0 %v341_v10 }
  0x69   :  { %571 = vmatprep.subr.mxu0 %v745_v0 }
  0x6a   :  { %572 = vmatpush3.msra.mxu0 %v340_v11 }
  0x6b   :  { %573 = vmatprep.subr.mxu0 %v745_v0 }
  0x6c   :  { %574 = vmatpush3.msra.mxu0 %v339_v12 }
  0x6d   :  { %575 = vmatprep.subr.mxu0 %v745_v0 }
  0x6e   :  { %576 = vmatpush3.msra.mxu0 %v338_v13 }
  0x6f   :  { %577 = vmatprep.subr.mxu0 %v745_v0 }
  0x70   :  { %578 = vmatpush3.msra.mxu0 %v337_v14 }
  0x71   :  { %579 = vmatprep.subr.mxu0 %v745_v0 }
  0x72   :  { %580 = vmatpush3.msra.mxu0 %v336_v15 }
  0x73   :  { %581 = vmatprep.subr.mxu0 %v745_v0 }
  0x74   :  { %582 = vmatpush3.msra.mxu0 %v335_v16 }
  0x75   :  { %583 = vmatprep.subr.mxu0 %v745_v0 }
  0x76   :  { %584 = vmatpush3.msra.mxu0 %v334_v17 }
  0x77   :  { %585 = vmatprep.subr.mxu0 %v745_v0 }
  0x78   :  { %586 = vmatpush3.msra.mxu0 %v333_v18 }
  0x79   :  { %587 = vmatprep.subr.mxu0 %v745_v0 }
  0x7a   :  { %588 = vmatpush3.msra.mxu0 %v332_v19 }
  0x7b   :  { %589 = vmatprep.subr.mxu0 %v745_v0 }
  0x7c   :  { %590 = vmatpush3.msra.mxu0 %v331_v20 }
  0x7d   :  { %591 = vmatprep.subr.mxu0 %v745_v0 }
  0x7e   :  { %592 = vmatpush3.msra.mxu0 %v330_v21 }
 0x11e   :  { %v168_v34 = vpop.f32.mrf.mxu0 }
 0x11f   :  { %v174_v35 = vrot.slane %v168_v34, 4  ;;  %v180_v36 = vmul.f32 %v168_v34, %v168_v34 }
 0x120   :  { %v525_v37 = vpop.f32.mrf.mxu0 }
 0x121   :  { %v175_v38 = vadd.f32 %v174_v35, %v168_v34  ;;  %v181_v39 = vrot.slane %v180_v36, 4 }
 0x123   :  { %v176_v40 = vrot.slane %v175_v38, 2  ;;  %v182_v41 = vadd.f32 %v181_v39, %v180_v36 }
 0x125   :  { %v177_v42 = vadd.f32 %v176_v40, %v175_v38  ;;  %v183_v43 = vrot.slane %v182_v41, 2 }
 0x127   :  { %v178_v44 = vrot.slane %v177_v42, 1  ;;  %v184_v45 = vadd.f32 %v183_v43, %v182_v41 }
 0x129   :  { %v179_v46 = vadd.f32 %v178_v44, %v177_v42  ;;  %v185_v47 = vrot.slane %v184_v45, 1  ;;  %v294_v42 = vld [vmem:[#allocation10 + $0x2] sm:$0x1] }
 0x12b   :  { %v186_v48 = vadd.f32 %v185_v47, %v184_v45  ;;  %v187_v49 = vmul.f32 0.125, %v179_v46  ;;  %v295_v45 = vld [vmem:[#allocation10 + $0x3] sm:$0x1] }
 0x12d   :  { %v188_v50 = vmul.f32 0.125, %v186_v48  ;;  %v189_v51 = vmul.f32 %v187_v49, %v187_v49 }
 0x12f   :  { %v190_v52 = vsub.f32 %v188_v50, %v189_v51 }
 0x131   :  { %v191_v53 = vmax.f32 %v190_v52, 0.0 }
 0x133   :  { %v192_v54 = vadd.f32 1e-05, %v191_v53  ;;  %v439_v53 = vld [vmem:[#allocation10 + $0x4] ss:$0 sm:$0xff] }
 0x135   :  { %606 = vrsqrt.f32 %v192_v54 }
 0x142   :  { %v607_v59 = vpop.eup %606 }
 0x143   :  { %v194_v60 = vmul.f32 %v607_v59, %v172_v57 }
 0x145   :  { %v200_v62 = vrot.slane %v194_v60, %v841_v58  ;;  %v195_v63 = vmul.f32 %v194_v60, %v187_v49 }
 0x147   :  { %v196_v1 = vsub.f32 %v173_v61, %v195_v63  ;;  %v201_v2 = vmul.f32 %v200_v62, %v168_v34 }
 0x149   :  { %v205_v3 = vrot.slane %v196_v1, %v841_v58 }
 0x14b   :  { %v206_v4 = vadd.f32 %v205_v3, %v201_v2 }
 0x14d   :  { %v207_v5 = vmax.f32 %v206_v4, 0.0 }
 0x14f   :  { %559 = vmatmul.mubr.f32.vlgmr.msra.gmra.mxu1 %v207_v5 }
 0x20f   :  { %v290_v22 = vpop.f32.mrf.mxu1 }
 0x210   :  { %v296_v23 = vrot.slane %v290_v22, 4  ;;  %v302_v24 = vmul.f32 %v290_v22, %v290_v22 }
 0x211   :  { %v560_v25 = vpop.f32.mrf.mxu1 }
 0x212   :  { %v297_v26 = vadd.f32 %v296_v23, %v290_v22  ;;  %v303_v27 = vrot.slane %v302_v24, 4 }
 0x214   :  { %v298_v28 = vrot.slane %v297_v26, 2  ;;  %v304_v29 = vadd.f32 %v303_v27, %v302_v24 }
 0x216   :  { %v299_v30 = vadd.f32 %v298_v28, %v297_v26  ;;  %v305_v31 = vrot.slane %v304_v29, 2 }
 0x218   :  { %v300_v32 = vrot.slane %v299_v30, 1  ;;  %v306_v33 = vadd.f32 %v305_v31, %v304_v29 }
 0x21a   :  { %v301_v34 = vadd.f32 %v300_v32, %v299_v30  ;;  %v307_v35 = vrot.slane %v306_v33, 1 }
 0x21c   :  { %v308_v36 = vadd.f32 %v307_v35, %v306_v33  ;;  %v309_v37 = vmul.f32 0.125, %v301_v34 }
 0x21e   :  { %v310_v38 = vmul.f32 0.125, %v308_v36  ;;  %v311_v39 = vmul.f32 %v309_v37, %v309_v37 }
 0x220   :  { %v312_v0 = vsub.f32 %v310_v38, %v311_v39 }
 0x222   :  { %v313_v40 = vmax.f32 %v312_v0, 0.0 }
 0x224   :  { %v314_v41 = vadd.f32 1e-05, %v313_v40 }
 0x226   :  { %608 = vrsqrt.f32 %v314_v41 }
 0x233   :  { %v609_v43 = vpop.eup %608 }
 0x234   :  { %v316_v44 = vmul.f32 %v609_v43, %v294_v42 }
 0x236   :  { %v317_v46 = vmul.f32 %v316_v44, %v309_v37  ;;  %v322_v47 = vrot.slane %v316_v44, %v841_v58 }
 0x238   :  { %v318_v48 = vsub.f32 %v295_v45, %v317_v46  ;;  %v323_v49 = vmul.f32 %v322_v47, %v290_v22 }
 0x23a   :  { %v327_v50 = vrot.slane %v318_v48, %v841_v58 }
 0x23c   :  { %v328_v51 = vadd.f32 %v327_v50, %v323_v49 }
 0x23e   :  { %v329_v52 = vmax.f32 %v328_v51, 0.0 }
 0x240   :  { %594 = vmatmul.mubr.f32.vlgmr.msra.gmra.mxu0 %v329_v52 }
 0x300   :  { %v417_v54 = vpop.f32.mrf.mxu0 }
 0x301   :  { %v418_v55 = vadd.f32 %v439_v53, %v417_v54 }
 0x302   :  { %v595_v56 = vpop.f32.mrf.mxu0 }
 0x303   :  { %421 = vst [vmem:[#allocation11] sm:$0xff] %v418_v55 }
 0x304   :  { %721 = shalt.err (!%p718_p1)
}
 0x305   :  { %431 = dma.vmem_to_hbm [thread:$0]  %s429_s4, 128, %s870_s5, [#allocation4]  }
 0x306   :  { %736 = dma.done.wait [#allocation4], 128  }
 0x307   :  { %737 = vsyncadd [#allocation4], 4294967168 }
 0x308   :  { %435 = vsyncpa [#allocation3], 1 }
 0x309   :  { %436 = vsyncpa [#allocation6], 1 }
 0x30a   :  { %437 = vsyncpa [#allocation9], 1 }
 0x30b   :  { %438 = vsyncpa [#allocation4], 1 }

</bundles_post_ra>
